<compile_context>
chip_gen: v5e
topology: v5e:2x2
jax: 0.10.0
libtpu: 0.0.40
codegen_flags: <defaults>
</compile_context>

<pallas_src>
import functools

import numpy as np
import jax
import jax.numpy as jnp
from jax.experimental import pallas as pl
from jax.experimental.pallas import tpu as pltpu


# ----------------------------- Pallas kernel --------------------------------

def _pars_fin_kernel(tau, soft_tile, in_tile_off,
                     rowtok_ref, logits_ref, gumbel_ref, out_ref):
    """One grid step == one (batch, L-tile) output block.

    rowtok_ref : (tile_L, 1) int32  constant-row token ids (-1 => soft row)
    logits_ref : (1, T, V)   f32    learnable logits for this batch
    gumbel_ref : (1, T, V)   f32    Gumbel(0,1) noise for this batch
    out_ref    : (1, tile_L, V)     output tile (bf16 by default)
    """
    T = logits_ref.shape[1]
    tile_L = out_ref.shape[1]
    V = out_ref.shape[2]

    # Constant one-hot rows for this tile (soft rows, marked -1, give zeros
    # but are never stored in the soft tile).
    lane = jax.lax.broadcasted_iota(jnp.int32, (tile_L, V), dimension=1)
    onehot = (lane == rowtok_ref[...]).astype(out_ref.dtype)

    lt = pl.program_id(1)

    @pl.when(lt != soft_tile)
    def _():
        out_ref[0] = onehot

    @pl.when(lt == soft_tile)
    def _():
        # Constant rows around the soft band -- written once, no double write.
        if in_tile_off > 0:
            out_ref[0, 0:in_tile_off, :] = onehot[0:in_tile_off]
        if in_tile_off + T < tile_L:
            out_ref[0, in_tile_off + T:, :] = onehot[in_tile_off + T:]

        # gumbel_softmax(tau, hard=True); all math in f32, cast only at store.
        x = (logits_ref[0] + gumbel_ref[0]) * (1.0 / tau)
        m = jnp.max(x, axis=-1, keepdims=True)
        e = jnp.exp(x - m)
        s = jnp.sum(e, axis=-1, keepdims=True)
        soft = e / s

        vidx = jax.lax.broadcasted_iota(jnp.int32, (T, V), dimension=1)
        first_max = jnp.min(jnp.where(x >= m, vidx, V), axis=-1, keepdims=True)
        hard = (vidx == first_max).astype(jnp.float32)

        # torch's hard gumbel-softmax forward value: (hard - soft) + soft
        st_val = (hard - soft) + soft
        # NOTE: in_tile_off is generally not sublane-aligned (layout is fixed
        # by the module: [start | prompt | soft | pad]); masked store of T rows
        # in a single tile per batch is negligible.
        out_ref[0, in_tile_off:in_tile_off + T, :] = st_val.astype(out_ref.dtype)


def _choose_tile_L(L, off, T, base=8):
    """Smallest multiple-of-8 row tile that contains the whole soft band."""
    if L <= base:
        return L
    tile = base
    while (off // tile) != ((off + T - 1) // tile):
        tile *= 2
        if tile >= L:
            return L
    return tile


def pars_forward_pallas(logits, gumbel, row_tok, tau, soft_offset,
                        out_dtype=jnp.bfloat16):
    """logits, gumbel: (B, T, V) f32; row_tok: (L, 1) int32.

    Returns fin: (B, L, V) = cat([start, prompt, gumbel_hard(logits), pad], 1).
    """
    B, T, V = logits.shape
    L = row_tok.shape[0]

    tile_L = _choose_tile_L(L, soft_offset, T)
    n_lt = pl.cdiv(L, tile_L)
    soft_tile = soft_offset // tile_L
    in_tile_off = soft_offset - soft_tile * tile_L

    kernel = functools.partial(
        _pars_fin_kernel, float(tau), int(soft_tile), int(in_tile_off))

    return pl.pallas_call(
        kernel,
        out_shape=jax.ShapeDtypeStruct((B, L, V), out_dtype),
        grid=(B, n_lt),
        in_specs=[
            pl.BlockSpec((tile_L, 1), lambda b, lt: (lt, 0)),    # row token ids
            pl.BlockSpec((1, T, V), lambda b, lt: (b, 0, 0)),    # logits
            pl.BlockSpec((1, T, V), lambda b, lt: (b, 0, 0)),    # gumbel noise
        ],
        out_specs=pl.BlockSpec((1, tile_L, V), lambda b, lt: (b, lt, 0)),
        compiler_params=pltpu.CompilerParams(
            dimension_semantics=("parallel", "parallel"),
            vmem_limit_bytes=32 * 1024 * 1024,
        ),
    )(row_tok, logits, gumbel)


# ------------------------------- Pars module ---------------------------------

class Pars:
    """JAX analogue of the PyTorch Pars module (scaled-down synthetic sizes)."""

    def __init__(self, key, batch_size, many_tokens, vocab, prompt_ids, total_len):
        self.batch_size = batch_size
        self.many_tokens = many_tokens
        self.vocab = vocab
        self.much_hard = 1000.0
        self.total_len = total_len

        # parameter: normal-initialized logits (torch .normal_() analogue)
        self.normu = jax.random.normal(
            key, (batch_size, many_tokens, vocab), dtype=jnp.float32)

        start_tok = vocab - 2   # analogue of 49406 (<|startoftext|>)
        pad_tok = vocab - 1     # analogue of 49407 (<|endoftext|>)
        self.start_tok = start_tok
        self.pad_tok = pad_tok
        self.prompt_ids = list(prompt_ids)

        # Per-row constant token-id table; -1 marks the rows the kernel fills
        # with the gumbel-softmax-hard output.  Replaces start/prompt/pad
        # one-hot tensors + torch.cat: constants are rebuilt in-kernel.
        off = 1 + len(prompt_ids)
        pad_len = total_len - (many_tokens + len(prompt_ids) + 1)
        assert pad_len >= 0
        row_tok = np.full((total_len, 1), pad_tok, dtype=np.int32)
        row_tok[0, 0] = start_tok
        for jk, pt in enumerate(prompt_ids):
            row_tok[1 + jk, 0] = int(pt)
        row_tok[off:off + many_tokens, 0] = -1
        self.row_tok = jnp.asarray(row_tok)
        self.soft_offset = off

    def forward(self, noise_key):
        g = jax.random.gumbel(noise_key, self.normu.shape, dtype=jnp.float32)
        return pars_forward_pallas(
            self.normu, g, self.row_tok, self.much_hard, self.soft_offset), g


# ------------------------------ pure-JAX/NumPy ref ---------------------------

def pars_forward_ref(logits, gumbel, row_tok, tau, soft_offset):
    logits = np.asarray(logits, np.float32)
    gumbel = np.asarray(gumbel, np.float32)
    row_tok = np.asarray(row_tok)
    B, T, V = logits.shape
    L = row_tok.shape[0]
    onehot = (np.arange(V)[None, :] == row_tok).astype(np.float32)   # (L, V)
    fin = np.broadcast_to(onehot, (B, L, V)).copy()
    x = (logits + gumbel) / tau
    e = np.exp(x - x.max(-1, keepdims=True))
    soft = e / e.sum(-1, keepdims=True)
    hard = np.zeros_like(soft)
    np.put_along_axis(hard, x.argmax(-1)[..., None], 1.0, axis=-1)
    fin[:, soft_offset:soft_offset + T, :] = (hard - soft) + soft
    return fin


# --------------------------------- main --------------------------------------

if __name__ == "__main__":
    # Small, module-consistent shapes:
    #   batch=2, many_tokens=4, vocab=512 (stand-in for 49408),
    #   prompt of 3 token ids, total sequence length 16 (stand-in for 77).
    batch_size = 2
    many_tokens = 4
    vocab = 512
    prompt_ids = [5, 17, 42]
    total_len = 16

    key = jax.random.PRNGKey(0)
    k_param, k_noise = jax.random.split(key)

    model = Pars(k_param, batch_size, many_tokens, vocab, prompt_ids, total_len)
    fin, g = model.forward(k_noise)
    fin = jax.block_until_ready(fin)

    # sanity checks
    assert fin.shape == (batch_size, total_len, vocab)
    assert fin.dtype == jnp.bfloat16
    fin_np = np.asarray(fin.astype(jnp.float32))

    # match the pure-JAX/NumPy reference (bf16 store tolerance)
    ref = pars_forward_ref(model.normu, g, model.row_tok,
                           model.much_hard, model.soft_offset)
    assert np.allclose(fin_np, ref, atol=1e-2)

    # every row is (numerically) a one-hot: row sums ~ 1, max entry ~ 1
    assert np.allclose(fin_np.sum(-1), 1.0, atol=1e-2)
    assert np.allclose(fin_np.max(-1), 1.0, atol=1e-2)

    # constant rows land on the expected token ids
    off = 1 + len(prompt_ids)
    assert np.all(fin_np[:, 0].argmax(-1) == vocab - 2)                    # start
    for jk, pt in enumerate(prompt_ids):
        assert np.all(fin_np[:, 1 + jk].argmax(-1) == pt)                  # prompt
    assert np.all(fin_np[:, off + many_tokens:].argmax(-1) == vocab - 1)   # pad

    # soft rows: exactly one entry >= 0.5 per row, at the argmax of logits+g
    soft_rows = fin_np[:, off:off + many_tokens]
    assert np.all((soft_rows >= 0.5).sum(-1) == 1)
    assert np.all(soft_rows.argmax(-1) ==
                  np.asarray(model.normu + g).argmax(-1))

    print("KERNEL_OK")
</pallas_src>

<mosaic_0001>
module attributes {stable_mosaic.version = 11 : i64} {
  func.func @_pars_fin_kernel(%arg0: i32, %arg1: i32, %arg2: memref<8x1xi32, #tpu.memory_space<vmem>>, %arg3: memref<1x4x512xf32, #tpu.memory_space<vmem>>, %arg4: memref<1x4x512xf32, #tpu.memory_space<vmem>>, %arg5: memref<1x8x512xbf16, #tpu.memory_space<vmem>>) attributes {dimension_semantics = [#tpu.dimension_semantics<parallel>, #tpu.dimension_semantics<parallel>], iteration_bounds = array<i64: 2, 2>, scalar_prefetch = 0 : i64, scratch_operands = 0 : i64, tpu.core_type = #tpu.core_type<tc>, window_params = [{transform_indices = @transform_0, window_bounds = array<i64: 8, 1>}, {transform_indices = @transform_1, window_bounds = array<i64: 1, 4, 512>}, {transform_indices = @transform_2, window_bounds = array<i64: 1, 4, 512>}, {transform_indices = @transform_3, window_bounds = array<i64: 1, 8, 512>}]} {
    %0 = tpu.iota {dimensions = array<i32: 1>} : vector<8x512xi32>
    %c0 = arith.constant 0 : index
    %c0_0 = arith.constant 0 : index
    %1 = vector.load %arg2[%c0, %c0_0] : memref<8x1xi32, #tpu.memory_space<vmem>>, vector<8x1xi32>
    %2 = vector.broadcast %1 : vector<8x1xi32> to vector<8x512xi32>
    %3 = arith.cmpi eq, %0, %2 : vector<8x512xi32>
    %4 = arith.extui %3 : vector<8x512xi1> to vector<8x512xi32>
    %5 = arith.sitofp %4 : vector<8x512xi32> to vector<8x512xf32>
    %6 = arith.truncf %5 : vector<8x512xf32> to vector<8x512xbf16>
    %c0_i32 = arith.constant 0 : i32
    %7 = arith.cmpi ne, %arg1, %c0_i32 : i32
    %8 = arith.extui %7 : i1 to i32
    %c0_i32_1 = arith.constant 0 : i32
    %9 = arith.cmpi ne, %8, %c0_i32_1 : i32
    scf.if %9 {
      %c0_4 = arith.constant 0 : index
      %c0_5 = arith.constant 0 : index
      %c0_6 = arith.constant 0 : index
      %13 = vector.load %arg5[%c0_4, %c0_5, %c0_6] : memref<1x8x512xbf16, #tpu.memory_space<vmem>>, vector<1x8x512xbf16>
      %14 = vector.shape_cast %13 : vector<1x8x512xbf16> to vector<8x512xbf16>
      %15 = vector.shape_cast %6 : vector<8x512xbf16> to vector<1x8x512xbf16>
      tpu.vector_store %arg5[%c0_4, %c0_5, %c0_6], %15 {strides = array<i32>} : memref<1x8x512xbf16, #tpu.memory_space<vmem>>, vector<1x8x512xbf16>,
    } else {
    }
    %c0_i32_2 = arith.constant 0 : i32
    %10 = arith.cmpi eq, %arg1, %c0_i32_2 : i32
    %11 = arith.extui %10 : i1 to i32
    %c0_i32_3 = arith.constant 0 : i32
    %12 = arith.cmpi ne, %11, %c0_i32_3 : i32
    scf.if %12 {
      %13 = vector.extract_strided_slice %6 {offsets = [0, 0], sizes = [4, 512], strides = [1, 1]} : vector<8x512xbf16> to vector<4x512xbf16>
      %c0_4 = arith.constant 0 : index
      %c0_5 = arith.constant 0 : index
      %c0_6 = arith.constant 0 : index
      %14 = vector.load %arg5[%c0_4, %c0_5, %c0_6] : memref<1x8x512xbf16, #tpu.memory_space<vmem>>, vector<1x4x512xbf16>
      %15 = vector.shape_cast %14 : vector<1x4x512xbf16> to vector<4x512xbf16>
      %16 = vector.shape_cast %13 : vector<4x512xbf16> to vector<1x4x512xbf16>
      tpu.vector_store %arg5[%c0_4, %c0_5, %c0_6], %16 {strides = array<i32>} : memref<1x8x512xbf16, #tpu.memory_space<vmem>>, vector<1x4x512xbf16>,
      %c0_7 = arith.constant 0 : index
      %c0_8 = arith.constant 0 : index
      %c0_9 = arith.constant 0 : index
      %17 = vector.load %arg3[%c0_7, %c0_8, %c0_9] : memref<1x4x512xf32, #tpu.memory_space<vmem>>, vector<1x4x512xf32>
      %18 = vector.shape_cast %17 : vector<1x4x512xf32> to vector<4x512xf32>
      %c0_10 = arith.constant 0 : index
      %c0_11 = arith.constant 0 : index
      %c0_12 = arith.constant 0 : index
      %19 = vector.load %arg4[%c0_10, %c0_11, %c0_12] : memref<1x4x512xf32, #tpu.memory_space<vmem>>, vector<1x4x512xf32>
      %20 = vector.shape_cast %19 : vector<1x4x512xf32> to vector<4x512xf32>
      %21 = arith.addf %18, %20 : vector<4x512xf32>
      %cst = arith.constant 1.000000e-03 : f32
      %22 = vector.broadcast %cst : f32 to vector<4x512xf32>
      %23 = arith.mulf %21, %22 : vector<4x512xf32>
      %cst_13 = arith.constant dense<0xFF800000> : vector<4xf32>
      %24 = vector.multi_reduction <maximumf>, %23, %cst_13 [1] : vector<4x512xf32> to vector<4xf32>
      %25 = vector.shape_cast %24 : vector<4xf32> to vector<4x1xf32>
      %26 = vector.broadcast %25 : vector<4x1xf32> to vector<4x512xf32>
      %27 = arith.subf %23, %26 : vector<4x512xf32>
      %28 = math.exp %27 : vector<4x512xf32>
      %cst_14 = arith.constant dense<0.000000e+00> : vector<4xf32>
      %29 = vector.multi_reduction <add>, %28, %cst_14 [1] : vector<4x512xf32> to vector<4xf32>
      %30 = vector.shape_cast %29 : vector<4xf32> to vector<4x1xf32>
      %31 = vector.broadcast %30 : vector<4x1xf32> to vector<4x512xf32>
      %32 = arith.divf %28, %31 : vector<4x512xf32>
      %33 = tpu.iota {dimensions = array<i32: 1>} : vector<4x512xi32>
      %34 = vector.broadcast %25 : vector<4x1xf32> to vector<4x512xf32>
      %35 = arith.cmpf oge, %23, %34 : vector<4x512xf32>
      %c512_i32 = arith.constant 512 : i32
      %36 = vector.broadcast %c512_i32 : i32 to vector<4x512xi32>
      %37 = arith.select %35, %33, %36 : vector<4x512xi1>, vector<4x512xi32>
      %cst_15 = arith.constant dense<2147483647> : vector<4xi32>
      %38 = vector.multi_reduction <minsi>, %37, %cst_15 [1] : vector<4x512xi32> to vector<4xi32>
      %39 = vector.shape_cast %38 : vector<4xi32> to vector<4x1xi32>
      %40 = vector.broadcast %39 : vector<4x1xi32> to vector<4x512xi32>
      %41 = arith.cmpi eq, %33, %40 : vector<4x512xi32>
      %42 = arith.extui %41 : vector<4x512xi1> to vector<4x512xi32>
      %43 = arith.sitofp %42 : vector<4x512xi32> to vector<4x512xf32>
      %44 = arith.subf %43, %32 : vector<4x512xf32>
      %45 = arith.addf %44, %32 : vector<4x512xf32>
      %46 = arith.truncf %45 : vector<4x512xf32> to vector<4x512xbf16>
      %c0_16 = arith.constant 0 : index
      %c4 = arith.constant 4 : index
      %c0_17 = arith.constant 0 : index
      %47 = vector.load %arg5[%c0_16, %c4, %c0_17] : memref<1x8x512xbf16, #tpu.memory_space<vmem>>, vector<1x4x512xbf16>
      %48 = vector.shape_cast %47 : vector<1x4x512xbf16> to vector<4x512xbf16>
      %49 = vector.shape_cast %46 : vector<4x512xbf16> to vector<1x4x512xbf16>
      tpu.vector_store %arg5[%c0_16, %c4, %c0_17], %49 {strides = array<i32>} : memref<1x8x512xbf16, #tpu.memory_space<vmem>>, vector<1x4x512xbf16>,
    } else {
    }
    return
  }
  func.func @transform_0(%arg0: i32, %arg1: i32) -> (i32, i32) {
    %c0_i32 = arith.constant 0 : i32
    %c0_i32_0 = arith.constant 0 : i32
    return %arg1, %c0_i32 : i32, i32
  }
  func.func @transform_1(%arg0: i32, %arg1: i32) -> (i32, i32, i32) {
    %c0_i32 = arith.constant 0 : i32
    %c0_i32_0 = arith.constant 0 : i32
    %c0_i32_1 = arith.constant 0 : i32
    return %arg0, %c0_i32, %c0_i32_0 : i32, i32, i32
  }
  func.func @transform_2(%arg0: i32, %arg1: i32) -> (i32, i32, i32) {
    %c0_i32 = arith.constant 0 : i32
    %c0_i32_0 = arith.constant 0 : i32
    %c0_i32_1 = arith.constant 0 : i32
    return %arg0, %c0_i32, %c0_i32_0 : i32, i32, i32
  }
  func.func @transform_3(%arg0: i32, %arg1: i32) -> (i32, i32, i32) {
    %c0_i32 = arith.constant 0 : i32
    %c0_i32_0 = arith.constant 0 : i32
    return %arg0, %arg1, %c0_i32 : i32, i32, i32
  }
}

</mosaic_0001>

<bundles_post_ra>
// kernel: tpu_custom_call.1
= control target key start
LH: loop header
LB: loop body
LE: loop exit
PB: predicated region body
PF: predicated region fallthrough
CT: control target
= control target key end

     0   :  { %s1222_s0 = inlined_call_operand.vmem [shape: s32[16,1], index: 0, kind: input, shape index: {}]   ;;  %s1223_s1 = inlined_call_operand.hbm [shape: f32[2,4,512], index: 1, kind: input, shape index: {}]   ;;  %s1224_s2 = inlined_call_operand.hbm [shape: f32[2,4,512], index: 2, kind: input, shape index: {}]   ;;  %s1225_s3 = inlined_call_operand.hbm [shape: bf16[2,16,512], index: 3, kind: output, shape index: {}]  }
   0x1   :  { %1231 = sst [smem:[#allocation17_spill]] %s1223_s1 }
   0x2   :  { %8 = vsyncpa [#allocation3], 0 }
   0x3   :  { %10 = vsyncpa [#allocation3 + $0x1], 0 }
   0x4   :  { %11 = vsyncpa [#allocation6], 0 }
   0x5   :  { %13 = vsyncpa [#allocation6 + $0x1], 0 }
   0x6   :  { %14 = vsyncpa [#allocation4], 0 }
   0x7   :  { %16 = vsyncpa [#allocation4 + $0x1], 0  ;;  %s976_s12 = smov 0   ;;  %s978_s13 = smov 0  }
   0x8   :  { %s980_s14 = smov 0   ;;  %s982_s15 = smov 0  }
   0x9   :  { %s984_s16 = smov 0   ;;  %s986_s17 = smov 0  }
   0xa   :  { %s988_s18 = smov 0   ;;  %s990_s19 = smov 0  }
   0xb   :  { %s992_s20 = smov 0   ;;  %s994_s21 = smov 0  }
   0xc   :  { %s996_s22 = smov 0  }
   0xd LB: > { %1232 = sst [smem:[#allocation11_spill]] %s930_s17  ;;  %s613_s23 = sadd.s32 4294967295, %s950_s22   ;;  %s950_s22 = sphi %s996_s22, %s22_s22   ;;  %s946_s21 = sphi %s994_s21, %s1248_s21   ;;  %s942_s20 = sphi %s992_s20, %s1247_s20   ;;  %s938_s19 = sphi %s990_s19, %s1246_s19   ;;  %s934_s18 = sphi %s988_s18, %s1245_s18   ;;  %s930_s17 = sphi %s986_s17, %s1244_s17   ;;  %s926_s16 = sphi %s984_s16, %s1253_s16   ;;  %s922_s15 = sphi %s982_s15, %s1252_s15   ;;  %s918_s14 = sphi %s980_s14, %s1251_s14   ;;  %s914_s13 = sphi %s978_s13, %s1250_s13   ;;  %s910_s12 = sphi %s976_s12, %s1249_s12  }
   0xe   : > { %1233 = sst [smem:[#allocation12_spill]] %s942_s20  ;;  %s614_s24 = sadd.s32 4294967294, %s950_s22  }
   0xf   : > { %1234 = sst [smem:[#allocation13_spill]] %s946_s21  ;;  %s31_s25 = sadd.s32 1, %s942_s20 }
  0x10   : > { %s34_s26 = sadd.s32 1, %s946_s21  ;;  %p32_p0 = scmp.ge.s32.totalorder %s31_s25, 2 }
  0x11   : > { %s67_s27 = sadd.s32 1, %s930_s17  ;;  %p74_p1 = scmp.ne.s32.totalorder %s930_s17, %s926_s16 }
  0x12   : > { %p75_p2 = scmp.eq.s32.totalorder %s950_s22, 0  ;;  %s1255_s25 = smov (%p32_p0, %s31_s25), 0 }
  0x13   : > { %1235 = sst [smem:[#allocation14_spill]] %s1255_s25  ;;  %s1257_s26 = smov (!%p32_p0, %s34_s26), %s946_s21 }
  0x14   : > { %p1040_p3 = por %p75_p2, %p74_p1  ;;  %p80_p4 = scmp.ne.s32.totalorder %s926_s16, %s922_s15 }
  0x15   : > { %p36_p5 = scmp.ge.s32.totalorder %s1257_s26, 2  ;;  %p81_p6 = scmp.eq.s32.totalorder %s613_s23, 0 }
  0x16   : > { %s117_s29 = ssub.s32 %s942_s20, %s1255_s25  ;;  %s121_s30 = sadd.s32 1, %s918_s14 }
  0x17   : > { %s1259_s26 = smov (%p36_p5, %s1257_s26), 0  ;;  %p1050_p7 = por %p81_p6, %p80_p4 }
  0x18   : > { %1237 = sst [smem:[#allocation15_spill]] %s1259_s26  ;;  %p131_p8 = scmp.ne.s32.totalorder %s918_s14, %s914_s13 }
  0x19   : > { %s64_s5 = ssub.s32 %s946_s21, %s1259_s26  ;;  %p132_p9 = scmp.eq.s32.totalorder %s613_s23, 3 }
  0x1a   : > { %p65_p10 = scmp.eq.s32.totalorder %s64_s5, 0  ;;  %s118_s6 = sor.u32 %s117_s29, %s64_s5 }
  0x1b   : > { %p119_p11 = scmp.eq.s32.totalorder %s118_s6, 0  ;;  %p1058_p12 = por %p132_p9, %p131_p8 }
  0x1c   : > { %s1063_s8 = scalar_select %p65_p10, %s930_s17, %s67_s27  }
  0x1d   : > { %s1066_s9 = scalar_select %p119_p11, %s918_s14, %s121_s30  }
  0x1e   : > { %1240 = sst [smem:[#allocation16_spill]] %s1063_s8  ;;  %p137_p13 = scmp.ne.s32.totalorder %s914_s13, %s910_s12 }
  0x1f   : > { %p138_p0 = scmp.eq.s32.totalorder %s614_s24, 3  ;;  %p663_p1 = scmp.lt.s32.totalorder %s950_s22, 4 }
  0x20   : > { %s165_s11 = sand.u32 1, %s930_s17   ;;  %s644_s23 = sshll.u32 %s946_s21, 4 }
  0x21   : > { %p1071_p2 = por %p138_p0, %p137_p13  ;;  %s617_s15 = sshll.u32 %s165_s11, 4 }
  0x22   : > { %s1242_s1 = sld [smem:[#allocation17_spill]]  ;;  %s169_s27 = scalar_lea.vmem [#allocation2], %s617_s15 }
  0x23   : > { %s178_s26 = sshll.u32 %s169_s27, 4  ;;  %p653_p4 = pnand %p663_p1, %p1040_p3  ;;  %s179_s26 = int_to_ptr.vmem [resolvable:$true] %s178_s26 }
  0x24   : > { %p623_p5 = scmp.ge.s32.totalorder %s950_s22, 1  ;;  %p203_p6 = scmp.lt.s32.totalorder %s950_s22, 5 }
  0x25   : > { %s166_s24 = scalar_lea.sflag [#allocation3], %s165_s11  ;;  %s194_s21 = scalar_lea.hbm %s1224_s2, %s644_s23 }
  0x26   : > { %p204_p8 = pnand %p623_p5, %p203_p6  ;;  %s189_s8 = scalar_lea.vmem [#allocation5], %s617_s15 }
  0x27   : > { %s198_s17 = sshll.u32 %s189_s8, 4  ;;  %s196_s29 = sshll.u32 %s194_s21, 4  ;;  %s199_s17 = int_to_ptr.vmem [resolvable:$true] %s198_s17  ;;  %s197_s29 = int_to_ptr.hbm [resolvable:$true] %s196_s29 }
  0x28   : > { %s174_s6 = scalar_lea.hbm %s1242_s1, %s644_s23  ;;  %s186_s5 = scalar_lea.sflag [#allocation6], %s165_s11 }
  0x29   : > { %s176_s25 = sshll.u32 %s174_s6, 4  ;;  %207 = sbr.rel (%p204_p8) target bundleno = 629 (0x275), region = 32  ;;  %s177_s25 = int_to_ptr.hbm [resolvable:$true] %s176_s25 }
  0x2a   : > { %655 = dma.hbm_to_vmem [thread:$0]  (!%p653_p4), %s177_s25, 256, %s179_s26, %s166_s24  }
  0x2b   : > { %658 = dma.hbm_to_vmem [thread:$0]  (!%p653_p4), %s197_s29, 256, %s199_s17, %s186_s5  }
  0x2c   : > { %s209_s28 = sand.u32 (!%p204_p8), 1, %s926_s16  }
  0x2d   : > { %s624_s6 = sshll.u32 (!%p204_p8), %s209_s28, 4  ;;  %s210_s27 = scalar_lea.sflag (!%p204_p8), [#allocation3], %s209_s28 }
  0x2e   : > { %s1088_s1 = scalar_lea.vmem [#allocation2], %s624_s6 }
  0x2f   : > { %897 = dma.done.wait (%p1050_p7), %s210_s27, 256  }
  0x30   : > { %899 = vsyncadd (%p1050_p7), %s210_s27, 4294967040  ;;  %s220_s20 = scalar_lea.sflag [#allocation6], %s209_s28  ;;  %s1094_s21 = scalar_lea.vmem [#allocation5], %s624_s6 }
  0x31   : > { %901 = dma.done.wait (%p1050_p7), %s220_s20, 256  }
  0x32   : > { %903 = vsyncadd (%p1050_p7), %s220_s20, 4294967040  ;;  %p256_p3 = scmp.lt.s32.totalorder %s934_s18, 1  ;;  %s253_s17 = sand.u32 1, %s914_s13   ;;  %v952_v0 = vmov 0   ;;  %v260_v2 = vlaneseq  ;;  %v953_v8 = vmov 0.0  }
  0x33   : > { %757 = vset.pattern.permute.xlu0 %v952_v0  ;;  %s626_s25 = sshll.u32 %s253_s17, 4  ;;  %p632_p7 = scmp.eq.s32.totalorder %s934_s18, 0 }
  0x34   : > { %s257_s26 = scalar_select %p256_p3, %s934_s18, 1  ;;  %v1108_v3 = vand.u32 127, %v260_v2 }
  0x35   : > { %s1123_s4 = scalar_lea.vmem [#allocation7], %s626_s25 }
  0x36   : > { %s627_s8 = sshll.u32 %s257_s26, 3  ;;  %v1111_v4 = vadd.s32 128, %v1108_v3  ;;  %v1114_v5 = vadd.s32 256, %v1108_v3  ;;  %v1117_v6 = vadd.s32 384, %v1108_v3 }
  0x37   : > { %s259_s23 = scalar_lea.vmem %s1222_s0, %s627_s8 }
  0x38   : > { %v265_v1 = vld [vmem:[%s259_s23] sm:$0xff] }
  0x39   : > { %267 = vperm.xlu0 %757, %v265_v1  }
  0xaa   : > { %286 = sbr.rel (%p632_p7) target bundleno = 178 (0xb2), region = 44 }
  0xab   : > { %v268_v7 = vpop.permute.xlu0 %267 }
  0xac   : > { %vm269_vm0 = vcmp.eq.s32.totalorder %v1108_v3, %v268_v7  ;;  %vm270_vm1 = vcmp.eq.s32.totalorder %v1111_v4, %v268_v7  ;;  %vm271_vm2 = vcmp.eq.s32.totalorder %v1114_v5, %v268_v7  ;;  %vm272_vm3 = vcmp.eq.s32.totalorder %v1117_v6, %v268_v7 }
  0xad   : > { %v628_v9 = vsel %vm269_vm0, 1.0, %v953_v8  ;;  %v629_v10 = vsel %vm270_vm1, 1.0, %v953_v8  ;;  %v630_v11 = vsel %vm271_vm2, 1.0, %v953_v8  ;;  %v631_v12 = vsel %vm272_vm3, 1.0, %v953_v8 }
  0xae   : > { %v281_v13 = vpack.c.bf16 %v629_v10, %v628_v9  ;;  %v282_v14 = vpack.c.bf16 %v631_v12, %v630_v11 }
  0xb0   : > { %287 = vst [vmem:[%s1123_s4] sm:$0xff] %v281_v13 }
  0xb1   : > { %288 = vst [vmem:[%s1123_s4 + $0x8] sm:$0xff] %v282_v14 }
  0xb2 PF: > { %p633_p9 = scmp.ne.s32.totalorder %s934_s18, 0 }
  0xb4   : > { %292 = sbr.rel (%p633_p9) target bundleno = 612 (0x264), region = 48 }
  0xb9   : > { %v295_v15 = vld [vmem:[%s1088_s1] sm:$0xff]  ;;  %v296_v16 = vld [vmem:[%s1088_s1 + $0x8] sm:$0xff]  ;;  %293 = vst [vmem:[%s1123_s4] sm:$0x33] %v281_v13  ;;  %vm316_vm4 = vcmask 1043456   ;;  %v954_v34 = vmov 839922192  }
  0xba   : > { %v297_v17 = vld [vmem:[%s1094_s21] sm:$0xff]  ;;  %v298_v18 = vld [vmem:[%s1094_s21 + $0x8] sm:$0xff]  ;;  %294 = vst [vmem:[%s1123_s4 + $0x8] sm:$0x33] %v282_v14  ;;  %v328_v35 = vunpack.c.l.s4 %v954_v34  ;;  %v384_v44 = vrot.slane %v1111_v4, 4  ;;  %v385_v46 = vrot.slane %v1117_v6, 4 }
  0xbb   : > { %v299_v19 = vadd.f32 %v297_v17, %v295_v15  ;;  %v300_v20 = vadd.f32 %v298_v18, %v296_v16 }
  0xbc   : > { %v329_v36 = vunpack.c.0.s8 %v328_v35  ;;  %v386_v47 = vsel %vm316_vm4, %v1108_v3, %v384_v44  ;;  %v387_v48 = vsel %vm316_vm4, %v1114_v5, %v385_v46 }
  0xbd   : > { %v301_v21 = vmul.f32 0.001, %v299_v19  ;;  %v302_v22 = vmul.f32 0.001, %v300_v20 }
  0xbf   : > { %305 = vst [vmem:[#allocation1] ss:$2 sm:$0xff] %v301_v21 }
  0xc0   : > { %307 = vst [vmem:[#allocation1 + $0x10] ss:$2 sm:$0xff] %v302_v22 }
  0xc6   : > { %v308_v23 = vld.sshfl [vmem:[#allocation1] sm:$0xff pattern:$0x75316420]  ;;  %v309_v24 = vld.sshfl [vmem:[#allocation1 + $0x8] sm:$0xff pattern:$0x75316420] }
  0xc7   : > { %v310_v25 = vld.sshfl [vmem:[#allocation1 + $0x10] sm:$0xff pattern:$0x75316420]  ;;  %v311_v26 = vld.sshfl [vmem:[#allocation1 + $0x18] sm:$0xff pattern:$0x75316420] }
  0xc8   : > { %v317_v27 = vsel %vm316_vm4, %v308_v23, -inf  ;;  %v318_v28 = vsel %vm316_vm4, %v309_v24, -inf  ;;  %v319_v29 = vsel %vm316_vm4, %v310_v25, -inf  ;;  %v320_v30 = vsel %vm316_vm4, %v311_v26, -inf }
  0xc9   : > { %v321_v31 = vmax.f32 %v317_v27, %v318_v28  ;;  %v322_v32 = vmax.f32 %v319_v29, %v320_v30 }
  0xcb   : > { %v323_v33 = vmax.f32 %v321_v31, %v322_v32 }
  0xcd   : > { %324 = vmax.xlane.f32.xlu0 %v323_v33 }
 0x140   : > { %v325_v37 = vpop.xlane.xlu0 %324 }
 0x141   : > { %v330_v38 = vperm.slane %v325_v37, %v329_v36 }
 0x143   : > { %v332_v39 = vsub.f32 %v301_v21, %v330_v38  ;;  %v333_v40 = vsub.f32 %v302_v22, %v330_v38  ;;  %vm382_vm5 = vcmp.ge.f32.partialorder %v301_v21, %v330_v38  ;;  %vm383_vm6 = vcmp.ge.f32.partialorder %v302_v22, %v330_v38 }
 0x144   : > { %v388_v49 = vsel %vm382_vm5, %v386_v47, 512  ;;  %v389_v54 = vsel %vm383_vm6, %v387_v48, 512 }
 0x145   : > { %v334_v41 = vmul.f32 1.442695, %v332_v39  ;;  %v336_v42 = vmul.f32 1.442695, %v333_v40 }
 0x147   : > { %758 = vpow2.f32 %v334_v41 }
 0x148   : > { %760 = vpow2.f32 %v336_v42  ;;  %v955_v42 = vmov 0.0  }
 0x14d   : > { %v1139_v43 = vpop.eup %758 }
 0x14e   : > { %v1142_v45 = vpop.eup %760  ;;  %340 = vst [vmem:[#allocation1] ss:$2 sm:$0xff] %v1139_v43 }
 0x14f   : > { %342 = vst [vmem:[#allocation1 + $0x10] ss:$2 sm:$0xff] %v1142_v45 }
 0x155   : > { %v343_v50 = vld.sshfl [vmem:[#allocation1] sm:$0xff pattern:$0x75316420]  ;;  %v344_v51 = vld.sshfl [vmem:[#allocation1 + $0x8] sm:$0xff pattern:$0x75316420] }
 0x156   : > { %v345_v52 = vld.sshfl [vmem:[#allocation1 + $0x10] sm:$0xff pattern:$0x75316420]  ;;  %v346_v53 = vld.sshfl [vmem:[#allocation1 + $0x18] sm:$0xff pattern:$0x75316420] }
 0x157   : > { %v351_v55 = vsel %vm316_vm4, %v343_v50, 0.0  ;;  %v352_v56 = vsel %vm316_vm4, %v344_v51, 0.0  ;;  %390 = vst [vmem:[#allocation1] ss:$2 sm:$0xff] %v388_v49  ;;  %v354_v58 = vsel %vm316_vm4, %v345_v52, 0.0  ;;  %v356_v60 = vsel %vm316_vm4, %v346_v53, 0.0 }
 0x158   : > { %v353_v57 = vadd.f32 %v352_v56, %v351_v55  ;;  %392 = vst [vmem:[#allocation1 + $0x10] ss:$2 sm:$0xff] %v389_v54 }
 0x15a   : > { %v355_v59 = vadd.f32 %v354_v58, %v353_v57 }
 0x15c   : > { %v357_v61 = vadd.f32 %v356_v60, %v355_v59 }
 0x15e   : > { %358 = vadd.xlane.f32.xlu1 %v357_v61  ;;  %v393_v62 = vld.sshfl [vmem:[#allocation1] sm:$0xff pattern:$0x75316420]  ;;  %v394_v63 = vld.sshfl [vmem:[#allocation1 + $0x8] sm:$0xff pattern:$0x75316420] }
 0x15f   : > { %v395_v0 = vld.sshfl [vmem:[#allocation1 + $0x10] sm:$0xff pattern:$0x75316420]  ;;  %v396_v1 = vld.sshfl [vmem:[#allocation1 + $0x18] sm:$0xff pattern:$0x75316420] }
 0x160   : > { %v397_v2 = vsel %vm316_vm4, %v393_v62, 2147483647  ;;  %v398_v7 = vsel %vm316_vm4, %v394_v63, 2147483647  ;;  %v399_v8 = vsel %vm316_vm4, %v395_v0, 2147483647 }
 0x161   : > { %v400_v9 = vsel %vm316_vm4, %v396_v1, 2147483647  ;;  %vm401_vm7 = vcmp.lt.s32.totalorder %v397_v2, %v398_v7 }
 0x162   : > { %v402_v10 = vsel %vm401_vm7, %v397_v2, %v398_v7  ;;  %vm403_vm8 = vcmp.lt.s32.totalorder %v399_v8, %v400_v9 }
 0x163   : > { %v404_v11 = vsel %vm403_vm8, %v399_v8, %v400_v9 }
 0x164   : > { %vm405_vm9 = vcmp.lt.s32.totalorder %v402_v10, %v404_v11 }
 0x165   : > { %v406_v12 = vsel %vm405_vm9, %v402_v10, %v404_v11 }
 0x166   : > { %v408_v13 = vshra.s32 %v406_v12, 16  ;;  %v407_v17 = vand.u32 65535, %v406_v12 }
 0x168   : > { %v410_v14 = vcvt.s32.f32 %v408_v13  ;;  %v409_v22 = vcvt.s32.f32 %v407_v17 }
 0x16a   : > { %411 = vmin.xlane.f32.xlu0 %v410_v14 }
 0x1d1   : > { %v359_v15 = vpop.xlane.xlu1 %358 }
 0x1d2   : > { %v364_v16 = vperm.slane %v359_v15, %v329_v36 }
 0x1d4   : > { %762 = vrcp.f32 %v364_v16  ;;  %v377_v23 = vand.u32 2147483648, %v364_v16  ;;  %v375_v25 = vand.u32 2147483647, %v364_v16  ;;  %vm371_vm12 = vweird.f32 %v364_v16 }
 0x1d6   : > { %v378_v28 = vor.u32 1.1754944e-38, %v377_v23  ;;  %vm376_vm14 = vcmp.eq.f32.partialorder %v375_v25, 8.507059e+37 }
 0x1da   : > { %v763_v18 = vpop.eup %762 }
 0x1db   : > { %v367_v19 = vmul.f32 %v763_v18, %v364_v16  ;;  %vm372_vm11 = vweird.f32 %v763_v18 }
 0x1dc   : > { %vm373_vm13 = vmor %vm371_vm12, %vm372_vm11 }
 0x1dd   : > { %v368_v20 = vsub.f32 1.0, %v367_v19  ;;  %v412_v21 = vpop.xlane.xlu0 %411 }
 0x1de   : > { %vm413_vm10 = vcmp.eq.f32.partialorder %v410_v14, %v412_v21  ;;  %v418_v37 = vcvt.f32.s32 %v412_v21 }
 0x1df   : > { %v369_v24 = vmul.f32 %v763_v18, %v368_v20  ;;  %v414_v26 = vsel %vm413_vm10, %v409_v22, inf }
 0x1e0   : > { %415 = vmin.xlane.f32.xlu1 %v414_v26  ;;  %v419_v39 = vshll.u32 %v418_v37, 16 }
 0x1e1   : > { %v370_v27 = vadd.f32 %v763_v18, %v369_v24 }
 0x1e3   : > { %v374_v29 = vsel %vm373_vm13, %v763_v18, %v370_v27 }
 0x1e4   : > { %v379_v30 = vsel %vm376_vm14, %v378_v28, %v374_v29 }
 0x1e5   : > { %v380_v31 = vmul.f32 %v1139_v43, %v379_v30  ;;  %v381_v32 = vmul.f32 %v1142_v45, %v379_v30 }
 0x1e7   : > { %435 = vst [vmem:[#allocation1] ss:$2 sm:$0xff] %v380_v31 }
 0x1e8   : > { %437 = vst [vmem:[#allocation1 + $0x10] ss:$2 sm:$0xff] %v381_v32 }
 0x1ee   : > { %v438_v33 = vld.sshfl [vmem:[#allocation1] sm:$0xff pattern:$0x75316420]  ;;  %v439_v34 = vld.sshfl [vmem:[#allocation1 + $0x8] sm:$0xff pattern:$0x75316420] }
 0x1ef   : > { %v440_v35 = vld.sshfl [vmem:[#allocation1 + $0x10] sm:$0xff pattern:$0x75316420]  ;;  %v441_v36 = vld.sshfl [vmem:[#allocation1 + $0x18] sm:$0xff pattern:$0x75316420] }
 0x1f0   : > { %450 = vst [vmem:[#allocation1] ss:$2 sm:$0xff] %v380_v31 }
 0x1f1   : > { %452 = vst [vmem:[#allocation1 + $0x10] ss:$2 sm:$0xff] %v381_v32 }
 0x1f7   : > { %v453_v47 = vld.sshfl [vmem:[#allocation1] sm:$0xff pattern:$0x75316420]  ;;  %v454_v48 = vld.sshfl [vmem:[#allocation1 + $0x8] sm:$0xff pattern:$0x75316420] }
 0x1f8   : > { %v456_v53 = vld.sshfl [vmem:[#allocation1 + $0x18] sm:$0xff pattern:$0x75316420] }
 0x253   : > { %v416_v38 = vpop.xlane.xlu1 %415 }
 0x254   : > { %v417_v40 = vcvt.f32.s32 %v416_v38 }
 0x256   : > { %v420_v41 = vadd.s32 %v419_v39, %v417_v40 }
 0x258   : > { %vm421_vm15 = vcmp.eq.s32.totalorder %v1108_v3, %v420_v41  ;;  %vm422_vm0 = vcmp.eq.s32.totalorder %v1111_v4, %v420_v41  ;;  %vm423_vm1 = vcmp.eq.s32.totalorder %v1114_v5, %v420_v41  ;;  %vm424_vm2 = vcmp.eq.s32.totalorder %v1117_v6, %v420_v41  ;;  %v455_v3 = vld.sshfl [vmem:[#allocation1 + $0x10] sm:$0xff pattern:$0x75316420] }
 0x259   : > { %v634_v43 = vsel %vm421_vm15, 1.0, %v955_v42  ;;  %v635_v44 = vsel %vm422_vm0, 1.0, %v955_v42  ;;  %v636_v45 = vsel %vm423_vm1, 1.0, %v955_v42  ;;  %v637_v46 = vsel %vm424_vm2, 1.0, %v955_v42 }
 0x25a   : > { %v446_v49 = vsub.f32 %v634_v43, %v438_v33  ;;  %v447_v50 = vsub.f32 %v635_v44, %v439_v34  ;;  %v448_v51 = vsub.f32 %v636_v45, %v440_v35  ;;  %v449_v52 = vsub.f32 %v637_v46, %v441_v36 }
 0x25c   : > { %v461_v4 = vadd.f32 %v453_v47, %v446_v49  ;;  %v462_v54 = vadd.f32 %v454_v48, %v447_v50  ;;  %v463_v5 = vadd.f32 %v455_v3, %v448_v51  ;;  %v464_v55 = vadd.f32 %v456_v53, %v449_v52 }
 0x25e   : > { %v465_v6 = vpack.c.bf16 %v462_v54, %v461_v4  ;;  %v466_v56 = vpack.c.bf16 %v464_v55, %v463_v5 }
 0x260   : > { %v469_v57 = vrot.slane %v465_v6, 6  ;;  %v470_v58 = vrot.slane %v466_v56, 6 }
 0x262   : > { %473 = vst [vmem:[%s1123_s4] sm:$0xcc] %v469_v57 }
 0x263   : > { %474 = vst [vmem:[%s1123_s4 + $0x8] sm:$0xcc] %v470_v58 }
 0x264 PF: > { %s639_s1 = sshll.u32 %s934_s18, 2  ;;  %s640_s24 = sshll.u32 %s938_s19, 3 }
 0x265   : > { %s491_s30 = sshll.u32 %s1123_s4, 4  ;;  %s487_s29 = sadd.s32 %s640_s24, %s639_s1  ;;  %s492_s30 = int_to_ptr.vmem [resolvable:$true] %s491_s30 }
 0x266   : > { %s641_s5 = sshll.u32 %s487_s29, 2  ;;  %s476_s21 = scalar_lea.sflag [#allocation4], %s253_s17 }
 0x267   : > { %s489_s27 = scalar_lea.hbm %s1225_s3, %s641_s5  ;;  %s844_s8 = scalar_lea.hbm %s1225_s3, 64 }
 0x268   : > { %s493_s20 = sshll.u32 %s489_s27, 4  ;;  %s494_s20 = int_to_ptr.hbm [resolvable:$true] %s493_s20 }
 0x269   : > { %s838_s25 = sshra.s32 %s494_s20, 4  ;;  %s839_s25 = int_to_ptr.hbm [resolvable:$true] %s838_s25 }
 0x26a   : > { %s840_s26 = scalar_lea.hbm %s839_s25, 16  ;;  %p845_p0 = scmp.lt.s32.totalorder %s839_s25, %s1225_s3 }
 0x26b   : > { %p841_p10 = scmp.ne.s32.totalorder %s839_s25, %s840_s26  ;;  %p846_p1 = scmp.lt.s32.totalorder %s844_s8, %s840_s26 }
 0x26d   : > { %p842_p11 = pnand %p841_p10, %p1058_p12  ;;  %p847_p4 = por %p846_p1, %p845_p0 }
 0x26f   : > { %p843_p13 = pneg %p842_p11 }
 0x271   : > { %p848_p5 = pnand %p847_p4, %p843_p13 }
 0x273   : > { %851 = shalt.err (!%p848_p5)
}
 0x274   : > { %650 = dma.vmem_to_hbm [thread:$0]  (%p1058_p12), %s492_s30, 256, %s494_s20, %s476_s21  }
 0x275 PF: > { %p664_p6 = scmp.ge.s32.totalorder %s950_s22, 2  ;;  %s505_s17 = sand.u32 1, %s910_s12  }
 0x276   : > { %s506_s23 = scalar_lea.sflag [#allocation4], %s505_s17 }
 0x277   : > { %p660_p8 = pnand %p664_p6, %p1071_p2 }
 0x279   : > { %p661_p3 = pneg %p660_p8 }
 0x27b   : > { %905 = dma.done.wait (%p661_p3), %s506_s23, 256  }
 0x27c   : > { %907 = vsyncadd (%p661_p3), %s506_s23, 4294967040  ;;  %s22_s22 = sadd.s32 1, %s950_s22   ;;  %s1243_s7 = sld [smem:[#allocation11_spill]] }
 0x27d   : > { %p19_p7 = scmp.ge.s32.totalorder %s22_s22, 6   ;;  %s1244_s17 = sld [smem:[#allocation16_spill]] }
 0x27e   : > { %s1245_s18 = sld [smem:[#allocation12_spill]]  ;;  %s1249_s12 = smov %s914_s13 }
 0x27f   : > { %s1246_s19 = sld [smem:[#allocation13_spill]]  ;;  %s1250_s13 = smov %s918_s14 }
 0x280   : > { %s1247_s20 = sld [smem:[#allocation14_spill]]  ;;  %s1251_s14 = smov %s1066_s9 }
 0x281   : > { %s1248_s21 = sld [smem:[#allocation15_spill]]  ;;  %s1252_s15 = smov %s926_s16 }
 0x282   : > { %s1253_s16 = smov %s1243_s7  ;;  %21 = sbr.rel (!%p19_p7) target bundleno = 13 (0xd), region = 106 }
 0x287   :  { %512 = vsyncpa [#allocation3], 1 }
 0x288   :  { %514 = vsyncpa [#allocation3 + $0x1], 1 }
 0x289   :  { %515 = vsyncpa [#allocation6], 1 }
 0x28a   :  { %517 = vsyncpa [#allocation6 + $0x1], 1 }
 0x28b   :  { %518 = vsyncpa [#allocation4], 1 }
 0x28c   :  { %520 = vsyncpa [#allocation4 + $0x1], 1 }

</bundles_post_ra>
